<compile_context>
chip_gen: v7x
topology: tpu7x:2x2x1
jax: 0.10.0
libtpu: 0.0.40
codegen_flags: <defaults>
</compile_context>

<pallas_src>
import math

import jax
import jax.numpy as jnp
from jax.experimental import pallas as pl
from jax.experimental.pallas import tpu as pltpu

HIDDEN = 256  # nn.Linear(input_nc, 256) -> ReLU -> nn.Linear(256, 256)


def _round_up(x, m):
    return ((x + m - 1) // m) * m


def _pick_tile_n(n, *, prefer_two_steps=False):
    """Rows per grid step along the patch axis.

    Large N (num_patches == 0 path): 256-multiple tiles up to 512 rows amortize
    the ~0.35us per-grid-step overhead and present a full 256-wide M to the
    v6e/v7x 2x256x256 MXU, while double-buffered tiles stay far inside v7x's
    64 MiB VMEM.  Small N (sampled path): one tile, or two tiles when the row
    axis is the only parallel grid axis so both v7x TensorCores get work.
    """
    if n >= 1024:
        return 512
    if n >= 512:
        return 256
    if n >= 256:
        return 128
    if prefer_two_steps and n >= 16:
        return _round_up((n + 1) // 2, 8)
    return _round_up(max(n, 8), 8)


def _vmem_limit_bytes(tile_n, c):
    # x(bf16) + out(f32) tiles and bf16 weights, all double-buffered, + slack.
    per_step = (tile_n * c * 2 + tile_n * HIDDEN * 4
                + c * HIDDEN * 2 + HIDDEN * HIDDEN * 2 + 2 * HIDDEN * 4)
    need = 2 * per_step + (2 << 20)
    # >= 32 MiB is within the scoped default of v6e/v7x and physical VMEM of
    # every generation; cap well below v7x's 64 MiB physical VMEM.
    return int(min(max(need, 32 * 1024 * 1024), 48 * 1024 * 1024))


def _mlp_l2norm_kernel(x_ref, w1_ref, b1_ref, w2_ref, b2_ref, o_ref):
    # x_ref: (TN, C) bf16, w1_ref: (C, 256) bf16, b1_ref: (1, 256) f32,
    # w2_ref: (256, 256) bf16, b2_ref: (1, 256) f32, o_ref: (TN, 256) f32.
    # bf16 operands feed the MXU; accumulation and all elementwise math in f32.
    h = jnp.dot(x_ref[...], w1_ref[...], preferred_element_type=jnp.float32)
    h = jnp.maximum(h + b1_ref[...], 0.0)                      # bias + ReLU (f32)
    y = jnp.dot(h.astype(jnp.bfloat16), w2_ref[...],
                preferred_element_type=jnp.float32) + b2_ref[...]
    # Normalize(power=2): y / (sqrt(sum(y^2, -1)) + 1e-7).  Reciprocal-multiply
    # keeps the per-element divide off the VALU path.
    norm = jnp.sqrt(jnp.sum(y * y, axis=-1, keepdims=True))
    inv = pl.reciprocal(norm + 1e-7, approx=False)
    o_ref[...] = (y * inv).astype(o_ref.dtype)


def _run_mlp_l2norm(samples, params):
    """Fused Linear->ReLU->Linear->L2norm for a group of feature levels.

    samples: list of (n, C_l) f32 arrays, all with the same n.
    params:  list of (w1 (C_l,256), b1 (256,), w2 (256,256), b2 (256,)).
    Returns a list of (n, 256) f32 arrays.
    """
    num_layers = len(samples)
    n = samples[0].shape[0]
    c_pad = max(s.shape[1] for s in samples)
    n_pad = _round_up(n, 8)

    def pad_x(s):
        return jnp.pad(s, ((0, n_pad - s.shape[0]), (0, c_pad - s.shape[1])))

    def pad_w1(w):
        # Zero rows for padded channels keep the matmul exact.
        return jnp.pad(w, ((0, c_pad - w.shape[0]), (0, 0)))

    # Single bf16 cast in the wrapper (MXU operands); biases stay f32.
    xs = jnp.stack([pad_x(s) for s in samples]).astype(jnp.bfloat16)
    w1s = jnp.stack([pad_w1(p[0]) for p in params]).astype(jnp.bfloat16)
    b1s = jnp.stack([p[1].reshape(1, HIDDEN) for p in params])
    w2s = jnp.stack([p[2] for p in params]).astype(jnp.bfloat16)
    b2s = jnp.stack([p[3].reshape(1, HIDDEN) for p in params])

    tile_n = _pick_tile_n(n_pad, prefer_two_steps=(num_layers == 1))
    grid = (num_layers, pl.cdiv(n_pad, tile_n))

    out = pl.pallas_call(
        _mlp_l2norm_kernel,
        out_shape=jax.ShapeDtypeStruct((num_layers, n_pad, HIDDEN), jnp.float32),
        grid_spec=pltpu.PrefetchScalarGridSpec(
            num_scalar_prefetch=0,
            grid=grid,
            in_specs=[
                pl.BlockSpec((None, tile_n, c_pad), lambda l, i: (l, i, 0)),
                pl.BlockSpec((None, c_pad, HIDDEN), lambda l, i: (l, 0, 0)),
                pl.BlockSpec((None, 1, HIDDEN), lambda l, i: (l, 0, 0)),
                pl.BlockSpec((None, HIDDEN, HIDDEN), lambda l, i: (l, 0, 0)),
                pl.BlockSpec((None, 1, HIDDEN), lambda l, i: (l, 0, 0)),
            ],
            out_specs=pl.BlockSpec((None, tile_n, HIDDEN),
                                   lambda l, i: (l, i, 0)),
        ),
        compiler_params=pltpu.CompilerParams(
            dimension_semantics=("parallel", "parallel"),
            vmem_limit_bytes=_vmem_limit_bytes(tile_n, c_pad)),
    )(xs, w1s, b1s, w2s, b2s)

    if n_pad != n:
        return [out[l, :n] for l in range(num_layers)]
    return [out[l] for l in range(num_layers)]


def _kaiming_normal(key, shape, fan_in):
    # kaiming_normal_(mode='fan_in', nonlinearity='relu'): std = sqrt(2 / fan_in)
    std = math.sqrt(2.0 / fan_in)
    return std * jax.random.normal(key, shape, dtype=jnp.float32)


def make_mlp_params(key, input_nc):
    """Params for nn.Sequential(Linear(input_nc,256), ReLU(), Linear(256,256))."""
    k1, k2, k3, k4 = jax.random.split(key, 4)
    # Stored as (in, out) so the kernel computes x @ W (PyTorch stores (out, in)).
    w1 = _kaiming_normal(k1, (input_nc, HIDDEN), fan_in=input_nc)
    w2 = _kaiming_normal(k2, (HIDDEN, HIDDEN), fan_in=HIDDEN)
    # init_weights leaves Linear biases at PyTorch default U(-1/sqrt(fan_in), +..)
    b1 = jax.random.uniform(k3, (HIDDEN,), jnp.float32,
                            -1.0 / math.sqrt(input_nc), 1.0 / math.sqrt(input_nc))
    b2 = jax.random.uniform(k4, (HIDDEN,), jnp.float32,
                            -1.0 / math.sqrt(HIDDEN), 1.0 / math.sqrt(HIDDEN))
    return w1, b1, w2, b2


def patch_sample_f(feats, params, num_patches=64, patch_ids=None, rng=None):
    """JAX/Pallas equivalent of PatchSampleF.forward.

    feats: list of NCHW arrays. params: list of (w1, b1, w2, b2) per feat.
    Returns (return_feats, return_ids).
    """
    if rng is None:
        rng = jax.random.PRNGKey(0)

    samples = []
    return_ids = []
    for feat_id, feat in enumerate(feats):
        B, C, H, W = feat.shape
        if num_patches > 0:
            if patch_ids is not None:
                patch_id = jnp.asarray(patch_ids[feat_id])
            else:
                rng, sub = jax.random.split(rng)
                perm = jax.random.permutation(sub, H * W)
                patch_id = perm[: int(min(num_patches, H * W))]
            # Gather BEFORE transposing: index NCHW directly -> (B, C, np),
            # then transpose only the small sampled tensor.  Avoids writing a
            # full (B, H*W, C) NHWC copy of the activation to HBM.
            rows = patch_id // W
            cols = patch_id % W
            gathered = feat[:, :, rows, cols]                       # (B, C, np)
            x_sample = jnp.transpose(gathered, (0, 2, 1)).reshape(-1, C)
        else:
            x_sample = jnp.transpose(feat, (0, 2, 3, 1)).reshape(-1, C)
            patch_id = jnp.zeros((0,), dtype=jnp.int32)
        samples.append(x_sample)
        return_ids.append(patch_id)

    # One fused pallas_call across all levels in the sampled path (they share
    # the same row count); otherwise one call per level with big tiles.
    if num_patches > 0 and len(set(s.shape[0] for s in samples)) == 1:
        outs = _run_mlp_l2norm(samples, params)
    else:
        outs = []
        for s, p in zip(samples, params):
            outs.extend(_run_mlp_l2norm([s], [p]))

    return_feats = []
    for feat, out in zip(feats, outs):
        B, C, H, W = feat.shape
        if num_patches == 0:
            out = jnp.transpose(out.reshape(B, H * W, HIDDEN),
                                (0, 2, 1)).reshape(B, HIDDEN, H, W)
        return_feats.append(out)
    return return_feats, return_ids


if __name__ == "__main__":
    key = jax.random.PRNGKey(0)
    k_f0, k_f1, k_p0, k_p1, k_rng = jax.random.split(key, 5)

    # Two feature maps, NCHW, small shapes.
    feat0 = jax.random.normal(k_f0, (2, 4, 16, 16), dtype=jnp.float32)
    feat1 = jax.random.normal(k_f1, (2, 8, 8, 8), dtype=jnp.float32)
    feats = [feat0, feat1]

    # Deterministic "create_mlp" parameters per feature (kaiming, relu).
    params = [make_mlp_params(k_p0, feat0.shape[1]),
              make_mlp_params(k_p1, feat1.shape[1])]

    return_feats, return_ids = patch_sample_f(
        feats, params, num_patches=64, patch_ids=None, rng=k_rng)

    for f in return_feats:
        jax.block_until_ready(f)

    # Sanity: shapes (B*num_patches, 256) and unit L2 norm per row.
    assert return_feats[0].shape == (2 * 64, HIDDEN)
    assert return_feats[1].shape == (2 * 64, HIDDEN)
    norms = jnp.linalg.norm(return_feats[0], axis=-1)
    assert bool(jnp.all(jnp.abs(norms - 1.0) < 1e-3))

    print("KERNEL_OK")
</pallas_src>

<mosaic_0001>
module attributes {stable_mosaic.version = 11 : i64} {
  func.func @_mlp_l2norm_kernel(%arg0: i32, %arg1: i32, %arg2: memref<1x128x8xbf16, #tpu.memory_space<vmem>>, %arg3: memref<1x8x256xbf16, #tpu.memory_space<vmem>>, %arg4: memref<1x1x256xf32, #tpu.memory_space<vmem>>, %arg5: memref<1x256x256xbf16, #tpu.memory_space<vmem>>, %arg6: memref<1x1x256xf32, #tpu.memory_space<vmem>>, %arg7: memref<1x128x256xf32, #tpu.memory_space<vmem>>) attributes {dimension_semantics = [#tpu.dimension_semantics<parallel>, #tpu.dimension_semantics<parallel>], iteration_bounds = array<i64: 2, 1>, scalar_prefetch = 0 : i64, scratch_operands = 0 : i64, tpu.core_type = #tpu.core_type<tc>, window_params = [{transform_indices = @transform_0, window_bounds = array<i64: 1, 128, 8>}, {transform_indices = @transform_1, window_bounds = array<i64: 1, 8, 256>}, {transform_indices = @transform_2, window_bounds = array<i64: 1, 1, 256>}, {transform_indices = @transform_3, window_bounds = array<i64: 1, 256, 256>}, {transform_indices = @transform_4, window_bounds = array<i64: 1, 1, 256>}, {transform_indices = @transform_5, window_bounds = array<i64: 1, 128, 256>}]} {
    %c0 = arith.constant 0 : index
    %c0_0 = arith.constant 0 : index
    %c0_1 = arith.constant 0 : index
    %0 = vector.load %arg2[%c0, %c0_0, %c0_1] : memref<1x128x8xbf16, #tpu.memory_space<vmem>>, vector<1x128x8xbf16>
    %1 = vector.shape_cast %0 : vector<1x128x8xbf16> to vector<128x8xbf16>
    %c0_2 = arith.constant 0 : index
    %c0_3 = arith.constant 0 : index
    %c0_4 = arith.constant 0 : index
    %2 = vector.load %arg3[%c0_2, %c0_3, %c0_4] : memref<1x8x256xbf16, #tpu.memory_space<vmem>>, vector<1x8x256xbf16>
    %3 = vector.shape_cast %2 : vector<1x8x256xbf16> to vector<8x256xbf16>
    %cst = arith.constant dense<0.000000e+00> : vector<128x256xf32>
    %4 = tpu.matmul %1, %3, %cst {dimension_numbers = #tpu.dot_dimension_numbers<[1], [0], [0], [1], [0, 0, 1, 1], [], []>} : vector<128x8xbf16>, vector<8x256xbf16>, vector<128x256xf32> -> vector<128x256xf32>
    %c0_5 = arith.constant 0 : index
    %c0_6 = arith.constant 0 : index
    %c0_7 = arith.constant 0 : index
    %5 = vector.load %arg4[%c0_5, %c0_6, %c0_7] : memref<1x1x256xf32, #tpu.memory_space<vmem>>, vector<1x1x256xf32>
    %6 = vector.shape_cast %5 : vector<1x1x256xf32> to vector<1x256xf32>
    %7 = vector.broadcast %6 : vector<1x256xf32> to vector<128x256xf32>
    %8 = arith.addf %4, %7 : vector<128x256xf32>
    %cst_8 = arith.constant 0.000000e+00 : f32
    %9 = vector.broadcast %cst_8 : f32 to vector<128x256xf32>
    %10 = arith.maximumf %8, %9 : vector<128x256xf32>
    %11 = arith.truncf %10 : vector<128x256xf32> to vector<128x256xbf16>
    %c0_9 = arith.constant 0 : index
    %c0_10 = arith.constant 0 : index
    %c0_11 = arith.constant 0 : index
    %12 = vector.load %arg5[%c0_9, %c0_10, %c0_11] : memref<1x256x256xbf16, #tpu.memory_space<vmem>>, vector<1x256x256xbf16>
    %13 = vector.shape_cast %12 : vector<1x256x256xbf16> to vector<256x256xbf16>
    %cst_12 = arith.constant dense<0.000000e+00> : vector<128x256xf32>
    %14 = tpu.matmul %11, %13, %cst_12 {dimension_numbers = #tpu.dot_dimension_numbers<[1], [0], [0], [1], [0, 0, 1, 1], [], []>} : vector<128x256xbf16>, vector<256x256xbf16>, vector<128x256xf32> -> vector<128x256xf32>
    %c0_13 = arith.constant 0 : index
    %c0_14 = arith.constant 0 : index
    %c0_15 = arith.constant 0 : index
    %15 = vector.load %arg6[%c0_13, %c0_14, %c0_15] : memref<1x1x256xf32, #tpu.memory_space<vmem>>, vector<1x1x256xf32>
    %16 = vector.shape_cast %15 : vector<1x1x256xf32> to vector<1x256xf32>
    %17 = vector.broadcast %16 : vector<1x256xf32> to vector<128x256xf32>
    %18 = arith.addf %14, %17 : vector<128x256xf32>
    %19 = arith.mulf %18, %18 : vector<128x256xf32>
    %cst_16 = arith.constant dense<0.000000e+00> : vector<128xf32>
    %20 = vector.multi_reduction <add>, %19, %cst_16 [1] : vector<128x256xf32> to vector<128xf32>
    %21 = vector.shape_cast %20 : vector<128xf32> to vector<128x1xf32>
    %22 = math.sqrt %21 : vector<128x1xf32>
    %cst_17 = arith.constant 1.000000e-07 : f32
    %23 = vector.broadcast %cst_17 : f32 to vector<128x1xf32>
    %24 = arith.addf %22, %23 : vector<128x1xf32>
    %25 = tpu.reciprocal %24 : vector<128x1xf32> -> vector<128x1xf32>
    %26 = vector.broadcast %25 : vector<128x1xf32> to vector<128x256xf32>
    %27 = arith.mulf %18, %26 : vector<128x256xf32>
    %c0_18 = arith.constant 0 : index
    %c0_19 = arith.constant 0 : index
    %c0_20 = arith.constant 0 : index
    %28 = vector.load %arg7[%c0_18, %c0_19, %c0_20] : memref<1x128x256xf32, #tpu.memory_space<vmem>>, vector<1x128x256xf32>
    %29 = vector.shape_cast %28 : vector<1x128x256xf32> to vector<128x256xf32>
    %30 = vector.shape_cast %27 : vector<128x256xf32> to vector<1x128x256xf32>
    tpu.vector_store %arg7[%c0_18, %c0_19, %c0_20], %30 {strides = array<i32>} : memref<1x128x256xf32, #tpu.memory_space<vmem>>, vector<1x128x256xf32>,
    return
  }
  func.func @transform_0(%arg0: i32, %arg1: i32) -> (i32, i32, i32) {
    %c0_i32 = arith.constant 0 : i32
    %c0_i32_0 = arith.constant 0 : i32
    return %arg0, %arg1, %c0_i32 : i32, i32, i32
  }
  func.func @transform_1(%arg0: i32, %arg1: i32) -> (i32, i32, i32) {
    %c0_i32 = arith.constant 0 : i32
    %c0_i32_0 = arith.constant 0 : i32
    %c0_i32_1 = arith.constant 0 : i32
    return %arg0, %c0_i32, %c0_i32_0 : i32, i32, i32
  }
  func.func @transform_2(%arg0: i32, %arg1: i32) -> (i32, i32, i32) {
    %c0_i32 = arith.constant 0 : i32
    %c0_i32_0 = arith.constant 0 : i32
    %c0_i32_1 = arith.constant 0 : i32
    return %arg0, %c0_i32, %c0_i32_0 : i32, i32, i32
  }
  func.func @transform_3(%arg0: i32, %arg1: i32) -> (i32, i32, i32) {
    %c0_i32 = arith.constant 0 : i32
    %c0_i32_0 = arith.constant 0 : i32
    %c0_i32_1 = arith.constant 0 : i32
    return %arg0, %c0_i32, %c0_i32_0 : i32, i32, i32
  }
  func.func @transform_4(%arg0: i32, %arg1: i32) -> (i32, i32, i32) {
    %c0_i32 = arith.constant 0 : i32
    %c0_i32_0 = arith.constant 0 : i32
    %c0_i32_1 = arith.constant 0 : i32
    return %arg0, %c0_i32, %c0_i32_0 : i32, i32, i32
  }
  func.func @transform_5(%arg0: i32, %arg1: i32) -> (i32, i32, i32) {
    %c0_i32 = arith.constant 0 : i32
    %c0_i32_0 = arith.constant 0 : i32
    return %arg0, %arg1, %c0_i32 : i32, i32, i32
  }
}

</mosaic_0001>

<bundles_post_ra>
// kernel: tpu_custom_call.1
= control target key start
LH: loop header
LB: loop body
LE: loop exit
PB: predicated region body
PF: predicated region fallthrough
CT: control target
= control target key end

     0   :  { %10 = vsyncpa [#allocation3], 0  ;;  %s2405_s0 = inlined_call_operand.vmem [shape: bf16[2,128,8], index: 0, kind: input, shape index: {}]   ;;  %s2406_s1 = inlined_call_operand.vmem [shape: bf16[2,8,256], index: 1, kind: input, shape index: {}]   ;;  %s2407_s2 = inlined_call_operand.vmem [shape: f32[2,1,256], index: 2, kind: input, shape index: {}]   ;;  %s2408_s3 = inlined_call_operand.hbm [shape: bf16[2,256,256], index: 3, kind: input, shape index: {}]   ;;  %s2409_s4 = inlined_call_operand.vmem [shape: f32[2,1,256], index: 4, kind: input, shape index: {}]   ;;  %s2410_s5 = inlined_call_operand.hbm [shape: f32[2,128,256], index: 5, kind: output, shape index: {}]  }
   0x1   :  { %12 = vsyncpa [#allocation3 + $0x1], 0 }
   0x2   :  { %13 = vsyncpa [#allocation4], 0 }
   0x3   :  { %15 = vsyncpa [#allocation4 + $0x1], 0  ;;  %s1824_s18 = smov 0   ;;  %s1826_s19 = smov 0  }
   0x4   :  { %s1828_s20 = smov 0   ;;  %s1830_s21 = smov 0  }
   0x5   :  { %s1832_s22 = smov 0   ;;  %s1834_s23 = smov 0  }
   0x6 LB: > { %s1376_s24 = sadd.s32 4294967295, %s1785_s23   ;;  %s1377_s25 = sadd.s32 4294967294, %s1785_s23   ;;  %s1785_s23 = sphi %s1834_s23, %s21_s23   ;;  %s1781_s22 = sphi %s1832_s22, %s2427_s22   ;;  %s1777_s21 = sphi %s1830_s21, %s2426_s21   ;;  %s1773_s20 = sphi %s1828_s20, %s2425_s20   ;;  %s1769_s19 = sphi %s1826_s19, %s2424_s19   ;;  %s1765_s18 = sphi %s1824_s18, %s2423_s18  }
   0x7   : > { %s33_s26 = sadd.s32 1, %s1781_s22  ;;  %s120_s27 = sadd.s32 1, %s1773_s20 }
   0x8   : > { %p35_p0 = scmp.ge.s32.totalorder %s33_s26, 2  ;;  %p127_p1 = scmp.ne.s32.totalorder %s1773_s20, %s1769_s19 }
   0x9   : > { %p128_p2 = scmp.eq.s32.totalorder %s1785_s23, 0  ;;  %p133_p3 = scmp.ne.s32.totalorder %s1769_s19, %s1765_s18 }
   0xa   : > { %s2429_s26 = smov (%p35_p0, %s33_s26), 0  ;;  %p134_p5 = scmp.eq.s32.totalorder %s1376_s24, 0 }
   0xb   : > { %p1865_p4 = por %p128_p2, %p127_p1  ;;  %s117_s29 = ssub.s32 %s1781_s22, %s2429_s26 }
   0xc   : > { %p185_p6 = scmp.eq.s32.totalorder %s1376_s24, 1  ;;  %p118_p7 = scmp.eq.s32.totalorder %s117_s29, 0 }
   0xd   : > { %p1871_p8 = por %p134_p5, %p133_p3  ;;  %p191_p10 = scmp.eq.s32.totalorder %s1377_s25, 1 }
   0xe   : > { %p1875_p9 = por %p185_p6, %p127_p1  ;;  %p1496_p13 = scmp.lt.s32.totalorder %s1785_s23, 2 }
   0xf   : > { %s1880_s7 = scalar_select %p118_p7, %s1773_s20, %s120_s27  }
  0x10   : > { %s2415_s6 = scalar_select %p1875_p9, 1, 0 }
  0x11   : > { %p1882_p11 = por %p191_p10, %p133_p3  ;;  %s239_s9 = sand.u32 1, %s1773_s20  }
  0x12   : > { %s1380_s10 = sshll.u32 %s239_s9, 8  ;;  %s1448_s11 = sshll.u32 %s1781_s22, 12 }
  0x13   : > { %s2416_s8 = scalar_select %p1882_p11, 1, 0 }
  0x14   : > { %s1893_s14 = scalar_lea.hbm %s2408_s3, %s1448_s11  ;;  %s243_s15 = scalar_lea.vmem [#allocation2], %s1380_s10 }
  0x15   : > { %s250_s16 = sshll.u32 %s243_s15, 4  ;;  %p1899_p0 = pnand %p1496_p13, %p1865_p4  ;;  %s1895_s16 = int_to_ptr.vmem [resolvable:$true] %s250_s16 }
  0x16   : > { %s1904_s24 = scalar_lea.sflag [#allocation3], %s239_s9  ;;  %s1673_s25 = scalar_lea.hbm %s1893_s14, 4096 }
  0x17   : > { %p1674_p2 = scmp.ne.s32.totalorder %s1893_s14, %s1673_s25  ;;  %p1675_p3 = pneg %p1899_p0 }
  0x18   : > { %s1678_s28 = scalar_lea.hbm %s2408_s3, 8192  ;;  %p1679_p4 = scmp.lt.u32.totalorder %s1893_s14, %s2408_s3 }
  0x19   : > { %p1676_p5 = pnand %p1675_p3, %p1674_p2  ;;  %p1680_p7 = scmp.lt.u32.totalorder %s1678_s28, %s1673_s25 }
  0x1a   : > { %p1682_p13 = scmp.lt.u32.totalorder %s1673_s25, %s1893_s14 }
  0x1b   : > { %p1677_p6 = pneg %p1676_p5  ;;  %p1681_p10 = por %p1680_p7, %p1679_p4 }
  0x1d   : > { %p1683_p12 = por %p1682_p13, %p1681_p10 }
  0x1f   : > { %p1684_p1 = pnand %p1683_p12, %p1677_p6 }
  0x21   : > { %1687 = shalt.err (!%p1684_p1)
}
  0x22   : > { %s1688_s9 = scalar_lea.vmem %s1895_s16, 4096  ;;  %s1787_s12 = smov [#allocation2]  }
  0x23   : > { %p1689_p2 = scmp.ne.s32.totalorder %s1895_s16, %s1688_s9  ;;  %s1693_s13 = sshll.u32 %s1787_s12, 4  ;;  %s1694_s13 = int_to_ptr.vmem [resolvable:$false] %s1693_s13 }
  0x24   : > { %s1695_s15 = scalar_lea.vmem %s1694_s13, 8192  ;;  %p1696_p9 = scmp.lt.s32.totalorder %s1895_s16, %s1694_s13 }
  0x25   : > { %p1691_p5 = pnand %p1689_p2, %p1675_p3  ;;  %p1697_p4 = scmp.lt.s32.totalorder %s1695_s15, %s1688_s9 }
  0x27   : > { %p1692_p11 = pneg %p1691_p5  ;;  %p1698_p7 = por %p1697_p4, %p1696_p9 }
  0x29   : > { %p1699_p10 = pnand %p1698_p7, %p1692_p11 }
  0x2b   : > { %1702 = shalt.err (!%p1699_p10)
}
  0x2c   : > { %s1788_s25 = smov 128   ;;  %s1789_s27 = smov 8  }
  0x2d   : > { %1491 = dma.hbm_to_vmem [thread:$0]  (!%p1899_p0), %s1893_s14, 4096, %s1895_s16, %s1904_s24, %s1788_s25, %s1788_s25, %s1789_s27  }
  0x2e   : > { %p265_p12 = scmp.lt.s32.totalorder %s1785_s23, 3  ;;  %p2418_p1 = scmp.ge.s32.totalorder %s1785_s23, 1 }
  0x30   : > { %p266_p3 = pnand %p2418_p1, %p265_p12 }
  0x31   : > { %s1936_s29 = sand.u32 (!%p266_p3), 1, %s1769_s19  }
  0x32   : > { %269 = sbr.rel (%p266_p3) target bundleno = 757 (0x2f5), region = 40  ;;  %s2412_s28 = sshll.u32 (!%p266_p3), %s1936_s29, 8 }
  0x33   : > { %s272_s10 = scalar_lea.sflag (!%p266_p3), [#allocation3], %s1936_s29  ;;  %s1942_s11 = scalar_lea.vmem (!%p266_p3), [#allocation2], %s2412_s28 }
  0x39   : > { %1756 = dma.done.wait (%p1871_p8), %s272_s10, 4096  }
  0x3a   : > { %1758 = vsyncadd (%p1871_p8), %s272_s10, 4294963200  ;;  %p325_p9 = scmp.lt.s32.totalorder %s1777_s21, 1  ;;  %v368_v0 = vlaneseq  ;;  %v1790_v1 = vmov 0   ;;  %vm448_vm0 = vcmask 1043456   ;;  %vm423_vm1 = vcmask 64512   ;;  %s1451_s24 = sshll.u32 %s1777_s21, 12 }
  0x3b   : > { %487 = vmatprep.mubr.bf16.mxu0 %v1790_v1  ;;  %v1561_v13 = vld [vmem:[%s1942_s11] ss:$8 sps:$4 sm:$0xff]   ;;  %v1563_v14 = vld [vmem:[%s1942_s11 + $0x4] ss:$8 sps:$4 sm:$0xff]   ;;  %v1566_v16 = vld [vmem:[%s1942_s11 + $0x14] ss:$8 sps:$4 sm:$0xff]   ;;  %s2348_s13 = scalar_lea.hbm %s2410_s5, %s1451_s24 }
  0x3c   : > { %s1951_s14 = scalar_select %p325_p9, %s1777_s21, 1  ;;  %v1953_v2 = vshrl.u32 %v368_v0, 7  ;;  %1452 = vmatprep.subr.bf16.mxu1 %v1563_v14  ;;  %v1564_v17 = vld [vmem:[%s1942_s11 + $0x10] ss:$8 sps:$4 sm:$0xff]   ;;  %v1569_v18 = vld [vmem:[%s1942_s11 + $0x24] ss:$8 sps:$4 sm:$0xff]  }
  0x3d   : > { %1468 = vmatpush1.bf16.msra.mxu1 %v1561_v13  ;;  %v1567_v19 = vld [vmem:[%s1942_s11 + $0x20] ss:$8 sps:$4 sm:$0xff]   ;;  %v1572_v20 = vld [vmem:[%s1942_s11 + $0x34] ss:$8 sps:$4 sm:$0xff]   ;;  %v1570_v22 = vld [vmem:[%s1942_s11 + $0x30] ss:$8 sps:$4 sm:$0xff]  }
  0x3e   : > { %s1449_s16 = sshll.u32 %s1951_s14, 6  ;;  %s1450_s17 = sshll.u32 %s1951_s14, 3  ;;  %v370_v3 = vsub.s32 0, %v1953_v2  ;;  %v374_v5 = vsub.s32 1, %v1953_v2  ;;  %1453 = vmatprep.subr.bf16.mxu1 %v1566_v16  ;;  %v1575_v23 = vld [vmem:[%s1942_s11 + $0x44] ss:$8 sps:$4 sm:$0xff]  }
  0x3f   : > { %s338_s9 = scalar_lea.vmem %s2406_s1, %s1450_s17  ;;  %s1963_s15 = scalar_lea.vmem %s2405_s0, %s1449_s16  ;;  %v1573_v24 = vld [vmem:[%s1942_s11 + $0x40] ss:$8 sps:$4 sm:$0xff]   ;;  %v1578_v25 = vld [vmem:[%s1942_s11 + $0x54] ss:$8 sps:$4 sm:$0xff]   ;;  %v1576_v27 = vld [vmem:[%s1942_s11 + $0x50] ss:$8 sps:$4 sm:$0xff]  }
  0x40   : > { %s1390_s25 = sshll.u32 %s1951_s14, 1  ;;  %v365_v4 = vld [vmem:[%s338_s9] sm:$0xff]  ;;  %v1554_v15 = vld [vmem:[%s1963_s15 + $0x8] sm:$0xff]   ;;  %v1555_v21 = vld [vmem:[%s1963_s15 + $0x10] sm:$0xff]   ;;  %s1222_s21 = scalar_lea.sflag [#allocation4], %s1936_s29 }
  0x41   : > { %s346_s28 = scalar_lea.vmem %s2409_s4, %s1390_s25  ;;  %v1401_v6 = vcombine.high %v365_v4, %v365_v4  ;;  %v1400_v8 = vcombine.low %v365_v4, %v365_v4  ;;  %v1553_v12 = vld [vmem:[%s1963_s15] sm:$0xff]   ;;  %1469 = vmatpush1.bf16.msra.mxu1 %v1564_v17  ;;  %v1556_v26 = vld [vmem:[%s1963_s15 + $0x18] sm:$0xff]   ;;  %v1558_v36 = vld [vmem:[%s1963_s15 + $0x28] sm:$0xff]   ;;  %s342_s17 = scalar_lea.vmem %s2407_s2, %s1390_s25 }
  0x42   : > { %v648_v7 = vld [vmem:[%s346_s28] sm:$0x3]  ;;  %1454 = vmatprep.subr.bf16.mxu1 %v1569_v18  ;;  %v1581_v28 = vld [vmem:[%s1942_s11 + $0x64] ss:$8 sps:$4 sm:$0xff]   ;;  %v1584_v30 = vld [vmem:[%s1942_s11 + $0x74] ss:$8 sps:$4 sm:$0xff]  }
  0x43   : > { %v1975_v9 = vrot.slane %v648_v7, %v370_v3  ;;  %v1979_v10 = vrot.slane %v648_v7, %v374_v5  ;;  %1402 = vmatprep.subr.msk.bf16.mxu0 %vm448_vm0, %v1401_v6  ;;  %v450_v11 = vsel %vm448_vm0, %v1400_v8, 0  ;;  %v1579_v29 = vld [vmem:[%s1942_s11 + $0x60] ss:$8 sps:$4 sm:$0xff]   ;;  %v1582_v32 = vld [vmem:[%s1942_s11 + $0x70] ss:$8 sps:$4 sm:$0xff]   ;;  %p2420_p11 = scmp.ne.s32.totalorder %s2415_s6, 0 }
  0x44   : > { %456 = vmatpush1.bf16.msra.mxu0 %v450_v11  ;;  %v1557_v31 = vld [vmem:[%s1963_s15 + $0x20] sm:$0xff]   ;;  %v1590_v35 = vld [vmem:[%s1942_s11 + $0x94] ss:$8 sps:$4 sm:$0xff]   ;;  %v1588_v37 = vld [vmem:[%s1942_s11 + $0x90] ss:$8 sps:$4 sm:$0xff]   ;;  %s1791_s25 = smov [#allocation5]  }
  0x45   : > { %820 = vmatprep.subr.bf16.mxu0 %v1563_v14  ;;  %1470 = vmatpush1.bf16.msra.mxu1 %v1567_v19  ;;  %v1587_v33 = vld [vmem:[%s1942_s11 + $0x84] ss:$8 sps:$4 sm:$0xff]   ;;  %v1585_v34 = vld [vmem:[%s1942_s11 + $0x80] ss:$8 sps:$4 sm:$0xff]   ;;  %v1596_v40 = vld [vmem:[%s1942_s11 + $0xb4] ss:$8 sps:$4 sm:$0xff]  }
  0x46   : > { %1455 = vmatprep.subr.bf16.mxu1 %v1572_v20  ;;  %v1593_v38 = vld [vmem:[%s1942_s11 + $0xa4] ss:$8 sps:$4 sm:$0xff]   ;;  %v1591_v39 = vld [vmem:[%s1942_s11 + $0xa0] ss:$8 sps:$4 sm:$0xff]   ;;  %v1559_v41 = vld [vmem:[%s1963_s15 + $0x30] sm:$0xff]   ;;  %s1707_s27 = sshll.u32 %s1791_s25, 4  ;;  %s1708_s27 = int_to_ptr.vmem [resolvable:$false] %s1707_s27 }
  0x47   : > { %1403 = vmatmul.mubr.msk.bf16.vlgmr.msra.gmra.mrb[0].mxu0 %vm423_vm1, %v1553_v12  ;;  %v1594_v42 = vld [vmem:[%s1942_s11 + $0xb0] ss:$8 sps:$4 sm:$0xff]   ;;  %v1599_v43 = vld [vmem:[%s1942_s11 + $0xc4] ss:$8 sps:$4 sm:$0xff]   ;;  %v1597_v44 = vld [vmem:[%s1942_s11 + $0xc0] ss:$8 sps:$4 sm:$0xff]  }
  0x48   : > { %497 = vmatprep.mubr.bf16.mxu0 %v1790_v1  ;;  %821 = vmatpush1.bf16.msra.mxu0 %v1561_v13  ;;  %v1602_v45 = vld [vmem:[%s1942_s11 + $0xd4] ss:$8 sps:$4 sm:$0xff]   ;;  %v1600_v47 = vld [vmem:[%s1942_s11 + $0xd0] ss:$8 sps:$4 sm:$0xff]   ;;  %v1605_v48 = vld [vmem:[%s1942_s11 + $0xe4] ss:$8 sps:$4 sm:$0xff]  }
  0x49   : > { %822 = vmatprep.subr.bf16.mxu0 %v1566_v16  ;;  %1471 = vmatpush1.bf16.msra.mxu1 %v1570_v22  ;;  %v1560_v46 = vld [vmem:[%s1963_s15 + $0x38] sm:$0xff]   ;;  %v1603_v49 = vld [vmem:[%s1942_s11 + $0xe0] ss:$8 sps:$4 sm:$0xff]   ;;  %s1709_s10 = scalar_lea.vmem %s1708_s27, 8192 }
  0x4a   : > { %1456 = vmatprep.subr.bf16.mxu1 %v1575_v23  ;;  %v1608_v50 = vld [vmem:[%s1942_s11 + $0xf4] ss:$8 sps:$4 sm:$0xff]   ;;  %v1606_v51 = vld [vmem:[%s1942_s11 + $0xf0] ss:$8 sps:$4 sm:$0xff]   ;;  %v366_v52 = vld [vmem:[%s342_s17] sm:$0x3] }
  0x4b   : > { %v2043_v53 = vrot.slane %v366_v52, %v370_v3  ;;  %v2047_v54 = vrot.slane %v366_v52, %v374_v5  ;;  %s2419_s11 = sshll.u32 %s1936_s29, 8 }
  0x4c   : > { %823 = vmatpush1.bf16.msra.mxu0 %v1564_v17  ;;  %s2248_s14 = scalar_lea.vmem [#allocation5], %s2419_s11 }
  0x4d   : > { %824 = vmatprep.subr.bf16.mxu0 %v1569_v18  ;;  %1472 = vmatpush1.bf16.msra.mxu1 %v1573_v24  ;;  %s1238_s30 = sshll.u32 %s2248_s14, 4  ;;  %s2350_s30 = int_to_ptr.vmem [resolvable:$true] %s1238_s30 }
  0x4e   : > { %1457 = vmatprep.subr.bf16.mxu1 %v1578_v25  ;;  %s1703_s15 = scalar_lea.vmem %s2350_s30, 4096  ;;  %p1710_p13 = scmp.lt.s32.totalorder %s2350_s30, %s1708_s27 }
  0x4f   : > { %1404 = vmatmul.mubr.msk.bf16.gmra.mrb[4].mxu0 %vm423_vm1, %v1554_v15  ;;  %p1704_p8 = scmp.ne.s32.totalorder %s2350_s30, %s1703_s15  ;;  %p1711_p2 = scmp.lt.s32.totalorder %s1709_s10, %s1703_s15 }
  0x50   : > { %507 = vmatprep.mubr.bf16.mxu0 %v1790_v1  ;;  %825 = vmatpush1.bf16.msra.mxu0 %v1567_v19 }
  0x51   : > { %826 = vmatprep.subr.bf16.mxu0 %v1572_v20  ;;  %1473 = vmatpush1.bf16.msra.mxu1 %v1576_v27  ;;  %p1705_p0 = pnand %p1704_p8, %p2420_p11  ;;  %p1712_p5 = por %p1711_p2, %p1710_p13 }
  0x52   : > { %1458 = vmatprep.subr.bf16.mxu1 %v1581_v28 }
  0x53   : > { %p1706_p6 = pneg %p1705_p0 }
  0x54   : > { %827 = vmatpush1.bf16.msra.mxu0 %v1570_v22 }
  0x55   : > { %828 = vmatprep.subr.bf16.mxu0 %v1575_v23  ;;  %1474 = vmatpush1.bf16.msra.mxu1 %v1579_v29  ;;  %p1713_p4 = pnand %p1712_p5, %p1706_p6 }
  0x56   : > { %1459 = vmatprep.subr.bf16.mxu1 %v1584_v30 }
  0x57   : > { %1405 = vmatmul.mubr.msk.bf16.gmra.mrb[8].mxu0 %vm423_vm1, %v1555_v21 }
  0x58   : > { %517 = vmatprep.mubr.bf16.mxu0 %v1790_v1  ;;  %829 = vmatpush1.bf16.msra.mxu0 %v1573_v24 }
  0x59   : > { %830 = vmatprep.subr.bf16.mxu0 %v1578_v25  ;;  %1475 = vmatpush1.bf16.msra.mxu1 %v1582_v32 }
  0x5a   : > { %1460 = vmatprep.subr.bf16.mxu1 %v1587_v33 }
  0x5c   : > { %831 = vmatpush1.bf16.msra.mxu0 %v1576_v27 }
  0x5d   : > { %832 = vmatprep.subr.bf16.mxu0 %v1581_v28  ;;  %1476 = vmatpush1.bf16.msra.mxu1 %v1585_v34 }
  0x5e   : > { %1461 = vmatprep.subr.bf16.mxu1 %v1590_v35 }
  0x5f   : > { %1406 = vmatmul.mubr.msk.bf16.gmra.mrb[12].mxu0 %vm423_vm1, %v1556_v26 }
  0x60   : > { %527 = vmatprep.mubr.bf16.mxu0 %v1790_v1  ;;  %833 = vmatpush1.bf16.msra.mxu0 %v1579_v29 }
  0x61   : > { %834 = vmatprep.subr.bf16.mxu0 %v1584_v30  ;;  %1477 = vmatpush1.bf16.msra.mxu1 %v1588_v37 }
  0x62   : > { %1462 = vmatprep.subr.bf16.mxu1 %v1593_v38 }
  0x64   : > { %835 = vmatpush1.bf16.msra.mxu0 %v1582_v32 }
  0x65   : > { %836 = vmatprep.subr.bf16.mxu0 %v1587_v33  ;;  %1478 = vmatpush1.bf16.msra.mxu1 %v1591_v39 }
  0x66   : > { %1463 = vmatprep.subr.bf16.mxu1 %v1596_v40 }
  0x67   : > { %1407 = vmatmul.mubr.msk.bf16.gmra.mrb[16].mxu0 %vm423_vm1, %v1557_v31 }
  0x68   : > { %537 = vmatprep.mubr.bf16.mxu0 %v1790_v1  ;;  %837 = vmatpush1.bf16.msra.mxu0 %v1585_v34 }
  0x69   : > { %838 = vmatprep.subr.bf16.mxu0 %v1590_v35  ;;  %1479 = vmatpush1.bf16.msra.mxu1 %v1594_v42 }
  0x6a   : > { %1464 = vmatprep.subr.bf16.mxu1 %v1599_v43 }
  0x6c   : > { %839 = vmatpush1.bf16.msra.mxu0 %v1588_v37 }
  0x6d   : > { %840 = vmatprep.subr.bf16.mxu0 %v1593_v38  ;;  %1480 = vmatpush1.bf16.msra.mxu1 %v1597_v44 }
  0x6e   : > { %1465 = vmatprep.subr.bf16.mxu1 %v1602_v45 }
  0x6f   : > { %1408 = vmatmul.mubr.msk.bf16.gmra.mrb[20].mxu0 %vm423_vm1, %v1558_v36 }
  0x70   : > { %547 = vmatprep.mubr.bf16.mxu0 %v1790_v1  ;;  %841 = vmatpush1.bf16.msra.mxu0 %v1591_v39 }
  0x71   : > { %842 = vmatprep.subr.bf16.mxu0 %v1596_v40  ;;  %1481 = vmatpush1.bf16.msra.mxu1 %v1600_v47 }
  0x72   : > { %1466 = vmatprep.subr.bf16.mxu1 %v1605_v48 }
  0x74   : > { %843 = vmatpush1.bf16.msra.mxu0 %v1594_v42 }
  0x75   : > { %844 = vmatprep.subr.bf16.mxu0 %v1599_v43  ;;  %1482 = vmatpush1.bf16.msra.mxu1 %v1603_v49 }
  0x76   : > { %1467 = vmatprep.subr.bf16.mxu1 %v1608_v50 }
  0x77   : > { %1409 = vmatmul.mubr.msk.bf16.gmra.mrb[24].mxu0 %vm423_vm1, %v1559_v41 }
  0x78   : > { %557 = vmatprep.mubr.bf16.mxu0 %v1790_v1  ;;  %845 = vmatpush1.bf16.msra.mxu0 %v1597_v44 }
  0x79   : > { %846 = vmatprep.subr.bf16.mxu0 %v1602_v45  ;;  %1483 = vmatpush1.bf16.msra.mxu1 %v1606_v51 }
  0x7c   : > { %847 = vmatpush1.bf16.msra.mxu0 %v1600_v47 }
  0x7d   : > { %848 = vmatprep.subr.bf16.mxu0 %v1605_v48 }
  0x7f   : > { %1410 = vmatmul.mubr.msk.bf16.gmra.mrb[28].mxu0 %vm423_vm1, %v1560_v46 }
  0x80   : > { %849 = vmatpush1.bf16.msra.mxu0 %v1603_v49 }
  0x81   : > { %850 = vmatprep.subr.bf16.mxu0 %v1608_v50 }
  0x84   : > { %851 = vmatpush1.bf16.msra.mxu0 %v1606_v51 }
 0x11a   : > { %v489_v55 = vpop.f32.mrb[0].mxu0 }
 0x11b   : > { %v490_v56 = vadd.f32 %v489_v55, %v2043_v53  ;;  %v491_v57 = vpop.f32.mrb[1].mxu0 }
 0x11c   : > { %v492_v58 = vadd.f32 %v491_v57, %v2047_v54  ;;  %v493_v59 = vpop.f32.mrb[2].mxu0 }
 0x11d   : > { %v494_v60 = vadd.f32 %v493_v59, %v2043_v53  ;;  %v495_v61 = vpop.f32.mrb[3].mxu0  ;;  %v568_v63 = vmax.f32 %v490_v56, 0.0 }
 0x11e   : > { %v496_v62 = vadd.f32 %v495_v61, %v2047_v54  ;;  %v569_v1 = vmax.f32 %v492_v58, 0.0 }
 0x11f   : > { %v570_v0 = vmax.f32 %v494_v60, 0.0 }
 0x120   : > { %v571_v3 = vmax.f32 %v496_v62, 0.0 }
 0x121   : > { %v600_v4 = vpack.c.bf16 %v570_v0, %v568_v63 }
 0x122   : > { %v601_v2 = vpack.c.bf16 %v571_v3, %v569_v1  ;;  %v499_v5 = vpop.f32.mrb[4].mxu0 }
 0x123   : > { %v500_v6 = vadd.f32 %v499_v5, %v2043_v53  ;;  %v501_v7 = vpop.f32.mrb[5].mxu0 }
 0x124   : > { %v502_v8 = vadd.f32 %v501_v7, %v2047_v54  ;;  %v503_v11 = vpop.f32.mrb[6].mxu0  ;;  %852 = vmatprep.mubr.bf16.mxu0 %v601_v2 }
 0x125   : > { %v504_v12 = vadd.f32 %v503_v11, %v2043_v53  ;;  %v505_v13 = vpop.f32.mrb[7].mxu0  ;;  %853 = vmatmul.mubr.bf16.vlgmr.msra.gmra.mrb[32].mxu0 %v600_v4  ;;  %v572_v15 = vmax.f32 %v500_v6, 0.0 }
 0x126   : > { %v506_v14 = vadd.f32 %v505_v13, %v2047_v54  ;;  %v573_v17 = vmax.f32 %v502_v8, 0.0 }
 0x127   : > { %v574_v16 = vmax.f32 %v504_v12, 0.0 }
 0x128   : > { %v575_v18 = vmax.f32 %v506_v14, 0.0 }
 0x129   : > { %v602_v19 = vpack.c.bf16 %v574_v16, %v572_v15 }
 0x12a   : > { %v603_v20 = vpack.c.bf16 %v575_v18, %v573_v17  ;;  %v509_v21 = vpop.f32.mrb[8].mxu0 }
 0x12b   : > { %v510_v22 = vadd.f32 %v509_v21, %v2043_v53  ;;  %v511_v23 = vpop.f32.mrb[9].mxu0 }
 0x12c   : > { %v512_v24 = vadd.f32 %v511_v23, %v2047_v54  ;;  %v513_v25 = vpop.f32.mrb[10].mxu0  ;;  %862 = vmatprep.mubr.bf16.mxu0 %v603_v20 }
 0x12d   : > { %v514_v26 = vadd.f32 %v513_v25, %v2043_v53  ;;  %v515_v27 = vpop.f32.mrb[11].mxu0  ;;  %863 = vmatmul.mubr.bf16.gmra.mrb[36].mxu0 %v602_v19  ;;  %v576_v29 = vmax.f32 %v510_v22, 0.0 }
 0x12e   : > { %v516_v28 = vadd.f32 %v515_v27, %v2047_v54  ;;  %v577_v31 = vmax.f32 %v512_v24, 0.0 }
 0x12f   : > { %v578_v30 = vmax.f32 %v514_v26, 0.0 }
 0x130   : > { %v579_v32 = vmax.f32 %v516_v28, 0.0 }
 0x131   : > { %v604_v33 = vpack.c.bf16 %v578_v30, %v576_v29 }
 0x132   : > { %v605_v34 = vpack.c.bf16 %v579_v32, %v577_v31  ;;  %v519_v35 = vpop.f32.mrb[12].mxu0 }
 0x133   : > { %v520_v36 = vadd.f32 %v519_v35, %v2043_v53  ;;  %v521_v37 = vpop.f32.mrb[13].mxu0 }
 0x134   : > { %v522_v38 = vadd.f32 %v521_v37, %v2047_v54  ;;  %v523_v39 = vpop.f32.mrb[14].mxu0  ;;  %872 = vmatprep.mubr.bf16.mxu0 %v605_v34 }
 0x135   : > { %v524_v40 = vadd.f32 %v523_v39, %v2043_v53  ;;  %v525_v41 = vpop.f32.mrb[15].mxu0  ;;  %873 = vmatmul.mubr.bf16.gmra.mrb[40].mxu0 %v604_v33  ;;  %v580_v43 = vmax.f32 %v520_v36, 0.0 }
 0x136   : > { %v526_v42 = vadd.f32 %v525_v41, %v2047_v54  ;;  %v581_v45 = vmax.f32 %v522_v38, 0.0 }
 0x137   : > { %v582_v44 = vmax.f32 %v524_v40, 0.0 }
 0x138   : > { %v583_v46 = vmax.f32 %v526_v42, 0.0 }
 0x139   : > { %v606_v47 = vpack.c.bf16 %v582_v44, %v580_v43 }
 0x13a   : > { %v529_v48 = vpop.f32.mrb[16].mxu0  ;;  %v607_v49 = vpack.c.bf16 %v583_v46, %v581_v45 }
 0x13b   : > { %v530_v50 = vadd.f32 %v529_v48, %v2043_v53  ;;  %v531_v51 = vpop.f32.mrb[17].mxu0 }
 0x13c   : > { %v532_v52 = vadd.f32 %v531_v51, %v2047_v54  ;;  %v533_v55 = vpop.f32.mrb[18].mxu0  ;;  %882 = vmatprep.mubr.bf16.mxu1 %v607_v49 }
 0x13d   : > { %v534_v56 = vadd.f32 %v533_v55, %v2043_v53  ;;  %v535_v57 = vpop.f32.mrb[19].mxu0  ;;  %883 = vmatmul.mubr.bf16.vlgmr.msra.gmra.mrb[0].mxu1 %v606_v47  ;;  %v584_v59 = vmax.f32 %v530_v50, 0.0 }
 0x13e   : > { %v536_v58 = vadd.f32 %v535_v57, %v2047_v54  ;;  %v585_v61 = vmax.f32 %v532_v52, 0.0 }
 0x13f   : > { %v586_v60 = vmax.f32 %v534_v56, 0.0 }
 0x140   : > { %v587_v62 = vmax.f32 %v536_v58, 0.0 }
 0x141   : > { %v608_v63 = vpack.c.bf16 %v586_v60, %v584_v59 }
 0x142   : > { %v609_v0 = vpack.c.bf16 %v587_v62, %v585_v61  ;;  %v539_v1 = vpop.f32.mrb[20].mxu0 }
 0x143   : > { %v540_v3 = vadd.f32 %v539_v1, %v2043_v53  ;;  %v541_v4 = vpop.f32.mrb[21].mxu0 }
 0x144   : > { %v542_v2 = vadd.f32 %v541_v4, %v2047_v54  ;;  %v543_v5 = vpop.f32.mrb[22].mxu0  ;;  %892 = vmatprep.mubr.bf16.mxu1 %v609_v0 }
 0x145   : > { %v544_v6 = vadd.f32 %v543_v5, %v2043_v53  ;;  %v545_v7 = vpop.f32.mrb[23].mxu0  ;;  %893 = vmatmul.mubr.bf16.gmra.mrb[4].mxu1 %v608_v63  ;;  %v588_v11 = vmax.f32 %v540_v3, 0.0 }
 0x146   : > { %v546_v8 = vadd.f32 %v545_v7, %v2047_v54  ;;  %v589_v13 = vmax.f32 %v542_v2, 0.0 }
 0x147   : > { %v590_v12 = vmax.f32 %v544_v6, 0.0 }
 0x148   : > { %v591_v14 = vmax.f32 %v546_v8, 0.0 }
 0x149   : > { %v610_v15 = vpack.c.bf16 %v590_v12, %v588_v11 }
 0x14a   : > { %v611_v16 = vpack.c.bf16 %v591_v14, %v589_v13  ;;  %v549_v17 = vpop.f32.mrb[24].mxu0 }
 0x14b   : > { %v550_v18 = vadd.f32 %v549_v17, %v2043_v53  ;;  %v551_v19 = vpop.f32.mrb[25].mxu0 }
 0x14c   : > { %v552_v20 = vadd.f32 %v551_v19, %v2047_v54  ;;  %v553_v21 = vpop.f32.mrb[26].mxu0  ;;  %902 = vmatprep.mubr.bf16.mxu1 %v611_v16 }
 0x14d   : > { %v554_v22 = vadd.f32 %v553_v21, %v2043_v53  ;;  %v555_v23 = vpop.f32.mrb[27].mxu0  ;;  %903 = vmatmul.mubr.bf16.gmra.mrb[8].mxu1 %v610_v15  ;;  %v592_v25 = vmax.f32 %v550_v18, 0.0 }
 0x14e   : > { %v556_v24 = vadd.f32 %v555_v23, %v2047_v54  ;;  %v593_v27 = vmax.f32 %v552_v20, 0.0 }
 0x14f   : > { %v594_v26 = vmax.f32 %v554_v22, 0.0 }
 0x150   : > { %v595_v28 = vmax.f32 %v556_v24, 0.0 }
 0x151   : > { %v612_v29 = vpack.c.bf16 %v594_v26, %v592_v25 }
 0x152   : > { %v613_v30 = vpack.c.bf16 %v595_v28, %v593_v27  ;;  %v559_v31 = vpop.f32.mrb[28].mxu0 }
 0x153   : > { %v560_v32 = vadd.f32 %v559_v31, %v2043_v53  ;;  %v561_v33 = vpop.f32.mrb[29].mxu0 }
 0x154   : > { %v562_v34 = vadd.f32 %v561_v33, %v2047_v54  ;;  %v563_v35 = vpop.f32.mrb[30].mxu0  ;;  %912 = vmatprep.mubr.bf16.mxu1 %v613_v30 }
 0x155   : > { %v564_v36 = vadd.f32 %v563_v35, %v2043_v53  ;;  %v565_v37 = vpop.f32.mrb[31].mxu0  ;;  %913 = vmatmul.mubr.bf16.gmra.mrb[12].mxu1 %v612_v29  ;;  %v596_v39 = vmax.f32 %v560_v32, 0.0 }
 0x156   : > { %v566_v38 = vadd.f32 %v565_v37, %v2047_v54  ;;  %v597_v41 = vmax.f32 %v562_v34, 0.0 }
 0x157   : > { %v598_v40 = vmax.f32 %v564_v36, 0.0 }
 0x158   : > { %v599_v42 = vmax.f32 %v566_v38, 0.0 }
 0x159   : > { %v614_v43 = vpack.c.bf16 %v598_v40, %v596_v39 }
 0x15a   : > { %v615_v44 = vpack.c.bf16 %v599_v42, %v597_v41 }
 0x15c   : > { %922 = vmatprep.mubr.bf16.mxu1 %v615_v44 }
 0x15d   : > { %923 = vmatmul.mubr.bf16.gmra.mrb[16].mxu1 %v614_v43 }
 0x1f8   : > { %v854_v45 = vpop.f32.mrb[32].mxu0 }
 0x1f9   : > { %v2082_v46 = vadd.f32 %v854_v45, %v1975_v9  ;;  %v856_v47 = vpop.f32.mrb[33].mxu0 }
 0x1fa   : > { %v2085_v48 = vadd.f32 %v856_v47, %v1979_v10  ;;  %v858_v53 = vpop.f32.mrb[34].mxu0 }
 0x1fb   : > { %v2088_v49 = vadd.f32 %v858_v53, %v1975_v9  ;;  %v860_v54 = vpop.f32.mrb[35].mxu0  ;;  %v933_v50 = vmul.f32 %v2082_v46, %v2082_v46 }
 0x1fc   : > { %v2093_v51 = vadd.f32 %v860_v54, %v1979_v10  ;;  %v934_v52 = vmul.f32 %v2085_v48, %v2085_v48 }
 0x1fd   : > { %v935_v55 = vmul.f32 %v2088_v49, %v2088_v49 }
 0x1fe   : > { %v936_v56 = vmul.f32 %v2093_v51, %v2093_v51  ;;  %v965_v57 = vadd.f32 %v934_v52, %v933_v50 }
 0x200   : > { %v864_v58 = vpop.f32.mrb[36].mxu0  ;;  %966 = vadd.xlane.f32.xlu0 %v965_v57  ;;  %v968_v63 = vadd.f32 %v936_v56, %v935_v55 }
 0x201   : > { %v2102_v59 = vadd.f32 %v864_v58, %v1975_v9  ;;  %v866_v60 = vpop.f32.mrb[37].mxu0 }
 0x202   : > { %v2105_v61 = vadd.f32 %v866_v60, %v1979_v10  ;;  %v868_v62 = vpop.f32.mrb[38].mxu0 }
 0x203   : > { %v2108_v0 = vadd.f32 %v868_v62, %v1975_v9  ;;  %v870_v1 = vpop.f32.mrb[39].mxu0  ;;  %v937_v3 = vmul.f32 %v2102_v59, %v2102_v59 }
 0x204   : > { %v2113_v4 = vadd.f32 %v870_v1, %v1979_v10  ;;  %969 = vadd.xlane.f32.xlu0 %v968_v63  ;;  %v938_v2 = vmul.f32 %v2105_v61, %v2105_v61 }
 0x205   : > { %v939_v5 = vmul.f32 %v2108_v0, %v2108_v0 }
 0x206   : > { %v940_v6 = vmul.f32 %v2113_v4, %v2113_v4  ;;  %v971_v7 = vadd.f32 %v938_v2, %v937_v3 }
 0x208   : > { %v874_v8 = vpop.f32.mrb[40].mxu0  ;;  %972 = vadd.xlane.f32.xlu1 %v971_v7  ;;  %v974_v15 = vadd.f32 %v940_v6, %v939_v5 }
 0x209   : > { %v2122_v11 = vadd.f32 %v874_v8, %v1975_v9  ;;  %v876_v12 = vpop.f32.mrb[41].mxu0 }
 0x20a   : > { %v2125_v13 = vadd.f32 %v876_v12, %v1979_v10  ;;  %v878_v14 = vpop.f32.mrb[42].mxu0 }
 0x20b   : > { %v941_v16 = vmul.f32 %v2122_v11, %v2122_v11  ;;  %v2130_v17 = vadd.f32 %v878_v14, %v1975_v9  ;;  %v880_v18 = vpop.f32.mrb[43].mxu0 }
 0x20c   : > { %v942_v19 = vmul.f32 %v2125_v13, %v2125_v13  ;;  %v2135_v20 = vadd.f32 %v880_v18, %v1979_v10  ;;  %975 = vadd.xlane.f32.xlu1 %v974_v15 }
 0x20d   : > { %v943_v21 = vmul.f32 %v2130_v17, %v2130_v17 }
 0x20e   : > { %v944_v22 = vmul.f32 %v2135_v20, %v2135_v20  ;;  %v977_v23 = vadd.f32 %v942_v19, %v941_v16 }
 0x210   : > { %v884_v24 = vpop.f32.mrb[0].mxu1  ;;  %978 = vadd.xlane.f32.xlu0 %v977_v23  ;;  %v980_v25 = vadd.f32 %v944_v22, %v943_v21 }
 0x211   : > { %v2142_v26 = vadd.f32 %v884_v24, %v1975_v9  ;;  %v886_v27 = vpop.f32.mrb[1].mxu1 }
 0x212   : > { %v2145_v28 = vadd.f32 %v886_v27, %v1979_v10  ;;  %v888_v29 = vpop.f32.mrb[2].mxu1  ;;  %981 = vadd.xlane.f32.xlu1 %v980_v25 }
 0x213   : > { %v945_v30 = vmul.f32 %v2142_v26, %v2142_v26  ;;  %v2150_v31 = vadd.f32 %v888_v29, %v1975_v9  ;;  %v890_v32 = vpop.f32.mrb[3].mxu1 }
 0x214   : > { %v946_v33 = vmul.f32 %v2145_v28, %v2145_v28  ;;  %v2155_v34 = vadd.f32 %v890_v32, %v1979_v10 }
 0x215   : > { %v947_v35 = vmul.f32 %v2150_v31, %v2150_v31 }
 0x216   : > { %v948_v36 = vmul.f32 %v2155_v34, %v2155_v34  ;;  %v983_v37 = vadd.f32 %v946_v33, %v945_v30 }
 0x218   : > { %v894_v38 = vpop.f32.mrb[4].mxu1  ;;  %984 = vadd.xlane.f32.xlu0 %v983_v37  ;;  %v986_v39 = vadd.f32 %v948_v36, %v947_v35 }
 0x219   : > { %v2162_v40 = vadd.f32 %v894_v38, %v1975_v9  ;;  %v896_v41 = vpop.f32.mrb[5].mxu1 }
 0x21a   : > { %v2165_v42 = vadd.f32 %v896_v41, %v1979_v10  ;;  %v898_v43 = vpop.f32.mrb[6].mxu1  ;;  %987 = vadd.xlane.f32.xlu1 %v986_v39 }
 0x21b   : > { %v949_v44 = vmul.f32 %v2162_v40, %v2162_v40  ;;  %v2170_v45 = vadd.f32 %v898_v43, %v1975_v9  ;;  %v900_v47 = vpop.f32.mrb[7].mxu1 }
 0x21c   : > { %v950_v53 = vmul.f32 %v2165_v42, %v2165_v42  ;;  %v2175_v54 = vadd.f32 %v900_v47, %v1979_v10 }
 0x21d   : > { %v951_v50 = vmul.f32 %v2170_v45, %v2170_v45 }
 0x21e   : > { %v952_v52 = vmul.f32 %v2175_v54, %v2175_v54  ;;  %v989_v55 = vadd.f32 %v950_v53, %v949_v44 }
 0x220   : > { %v904_v56 = vpop.f32.mrb[8].mxu1  ;;  %990 = vadd.xlane.f32.xlu0 %v989_v55  ;;  %v992_v57 = vadd.f32 %v952_v52, %v951_v50 }
 0x221   : > { %v2182_v58 = vadd.f32 %v904_v56, %v1975_v9  ;;  %v906_v60 = vpop.f32.mrb[9].mxu1 }
 0x222   : > { %v2185_v62 = vadd.f32 %v906_v60, %v1979_v10  ;;  %v908_v63 = vpop.f32.mrb[10].mxu1  ;;  %993 = vadd.xlane.f32.xlu1 %v992_v57 }
 0x223   : > { %v953_v1 = vmul.f32 %v2182_v58, %v2182_v58  ;;  %v2190_v3 = vadd.f32 %v908_v63, %v1975_v9  ;;  %v910_v2 = vpop.f32.mrb[11].mxu1 }
 0x224   : > { %v954_v5 = vmul.f32 %v2185_v62, %v2185_v62  ;;  %v2195_v6 = vadd.f32 %v910_v2, %v1979_v10 }
 0x225   : > { %v955_v7 = vmul.f32 %v2190_v3, %v2190_v3 }
 0x226   : > { %v956_v8 = vmul.f32 %v2195_v6, %v2195_v6  ;;  %v995_v12 = vadd.f32 %v954_v5, %v953_v1 }
 0x228   : > { %v914_v14 = vpop.f32.mrb[12].mxu1  ;;  %996 = vadd.xlane.f32.xlu0 %v995_v12  ;;  %v998_v15 = vadd.f32 %v956_v8, %v955_v7 }
 0x229   : > { %v2202_v16 = vadd.f32 %v914_v14, %v1975_v9  ;;  %v916_v18 = vpop.f32.mrb[13].mxu1 }
 0x22a   : > { %v2205_v19 = vadd.f32 %v916_v18, %v1979_v10  ;;  %v918_v21 = vpop.f32.mrb[14].mxu1  ;;  %999 = vadd.xlane.f32.xlu1 %v998_v15 }
 0x22b   : > { %v957_v22 = vmul.f32 %v2202_v16, %v2202_v16  ;;  %v2210_v23 = vadd.f32 %v918_v21, %v1975_v9  ;;  %v920_v24 = vpop.f32.mrb[15].mxu1 }
 0x22c   : > { %v958_v25 = vmul.f32 %v2205_v19, %v2205_v19  ;;  %v2215_v27 = vadd.f32 %v920_v24, %v1979_v10 }
 0x22d   : > { %v959_v29 = vmul.f32 %v2210_v23, %v2210_v23 }
 0x22e   : > { %v960_v30 = vmul.f32 %v2215_v27, %v2215_v27  ;;  %v1001_v32 = vadd.f32 %v958_v25, %v957_v22 }
 0x230   : > { %v924_v33 = vpop.f32.mrb[16].mxu1  ;;  %1002 = vadd.xlane.f32.xlu0 %v1001_v32  ;;  %v1004_v35 = vadd.f32 %v960_v30, %v959_v29 }
 0x231   : > { %v2222_v36 = vadd.f32 %v924_v33, %v1975_v9  ;;  %v926_v37 = vpop.f32.mrb[17].mxu1 }
 0x232   : > { %v2225_v38 = vadd.f32 %v926_v37, %v1979_v10  ;;  %v928_v39 = vpop.f32.mrb[18].mxu1  ;;  %1005 = vadd.xlane.f32.xlu1 %v1004_v35 }
 0x233   : > { %v961_v41 = vmul.f32 %v2222_v36, %v2222_v36  ;;  %v2230_v43 = vadd.f32 %v928_v39, %v1975_v9  ;;  %v930_v44 = vpop.f32.mrb[19].mxu1 }
 0x234   : > { %v962_v47 = vmul.f32 %v2225_v38, %v2225_v38  ;;  %v2235_v53 = vadd.f32 %v930_v44, %v1979_v10 }
 0x235   : > { %v963_v50 = vmul.f32 %v2230_v43, %v2230_v43 }
 0x236   : > { %v964_v52 = vmul.f32 %v2235_v53, %v2235_v53  ;;  %v1007_v55 = vadd.f32 %v962_v47, %v961_v41 }
 0x238   : > { %1008 = vadd.xlane.f32.xlu0 %v1007_v55  ;;  %v1010_v56 = vadd.f32 %v964_v52, %v963_v50 }
 0x23a   : > { %1011 = vadd.xlane.f32.xlu1 %v1010_v56 }
 0x28d   : > { %v967_v57 = vpop.xlane.xlu0 %966 }
 0x28e   : > { %1609 = vrsqrt.f32 %v967_v57  ;;  %vm1015_vm2 = vcmp.eq.f32.partialorder %v967_v57, inf  ;;  %v1018_v2 = vand.u32 2147483648, %v967_v57  ;;  %vm1017_vm3 = vcmp.eq.f32.partialorder %v967_v57, 0.0 }
 0x291   : > { %v970_v9 = vpop.xlane.xlu0 %969 }
 0x292   : > { %1611 = vrsqrt.f32 %v970_v9  ;;  %vm1022_vm4 = vcmp.eq.f32.partialorder %v970_v9, inf  ;;  %v1025_v18 = vand.u32 2147483648, %v970_v9  ;;  %vm1024_vm5 = vcmp.eq.f32.partialorder %v970_v9, 0.0 }
 0x295   : > { %v973_v60 = vpop.xlane.xlu1 %972 }
 0x296   : > { %1613 = vrsqrt.f32 %v973_v60  ;;  %vm1029_vm6 = vcmp.eq.f32.partialorder %v973_v60, inf  ;;  %v1032_v32 = vand.u32 2147483648, %v973_v60  ;;  %vm1031_vm7 = vcmp.eq.f32.partialorder %v973_v60, 0.0 }
 0x298   : > { %v1610_v63 = vpop.eup %1609 }
 0x299   : > { %v1014_v1 = vmul.f32 %v1610_v63, %v967_v57  ;;  %v976_v10 = vpop.xlane.xlu1 %975 }
 0x29a   : > { %1615 = vrsqrt.f32 %v976_v10  ;;  %vm1036_vm8 = vcmp.eq.f32.partialorder %v976_v10, inf  ;;  %v1039_v47 = vand.u32 2147483648, %v976_v10  ;;  %vm1038_vm9 = vcmp.eq.f32.partialorder %v976_v10, 0.0 }
 0x29b   : > { %v1016_v5 = vsel %vm1015_vm2, %v967_v57, %v1014_v1 }
 0x29c   : > { %v1612_v7 = vpop.eup %1611  ;;  %v1019_v8 = vsel %vm1017_vm3, %v1018_v2, %v1016_v5 }
 0x29d   : > { %v1125_v12 = vadd.f32 1e-07, %v1019_v8  ;;  %v1021_v14 = vmul.f32 %v1612_v7, %v970_v9  ;;  %v979_v15 = vpop.xlane.xlu0 %978 }
 0x29e   : > { %1617 = vrsqrt.f32 %v979_v15  ;;  %vm1043_vm10 = vcmp.eq.f32.partialorder %v979_v15, inf  ;;  %v1046_v5 = vand.u32 2147483648, %v979_v15  ;;  %vm1045_vm11 = vcmp.eq.f32.partialorder %v979_v15, 0.0 }
 0x29f   : > { %1619 = vrcp.f32 %v1125_v12  ;;  %v1023_v21 = vsel %vm1022_vm4, %v970_v9, %v1021_v14  ;;  %v982_v22 = vpop.xlane.xlu1 %981 }
 0x2a0   : > { %v1614_v24 = vpop.eup %1613  ;;  %v1026_v25 = vsel %vm1024_vm5, %v1025_v18, %v1023_v21  ;;  %1621 = vrsqrt.f32 %v982_v22  ;;  %vm1050_vm12 = vcmp.eq.f32.partialorder %v982_v22, inf  ;;  %vm1052_vm13 = vcmp.eq.f32.partialorder %v982_v22, 0.0 }
 0x2a1   : > { %v1126_v29 = vadd.f32 1e-07, %v1026_v25  ;;  %v1028_v30 = vmul.f32 %v1614_v24, %v973_v60 }
 0x2a3   : > { %1623 = vrcp.f32 %v1126_v29  ;;  %v1030_v33 = vsel %vm1029_vm6, %v973_v60, %v1028_v30 }
 0x2a4   : > { %v1616_v35 = vpop.eup %1615  ;;  %v1033_v37 = vsel %vm1031_vm7, %v1032_v32, %v1030_v33 }
 0x2a5   : > { %v1127_v39 = vadd.f32 1e-07, %v1033_v37  ;;  %v1035_v41 = vmul.f32 %v1616_v35, %v976_v10  ;;  %v985_v44 = vpop.xlane.xlu0 %984 }
 0x2a6   : > { %1625 = vrsqrt.f32 %v985_v44  ;;  %vm1057_vm14 = vcmp.eq.f32.partialorder %v985_v44, inf  ;;  %v1060_v35 = vand.u32 2147483648, %v985_v44  ;;  %vm1059_vm15 = vcmp.eq.f32.partialorder %v985_v44, 0.0 }
 0x2a7   : > { %1627 = vrcp.f32 %v1127_v39  ;;  %v1037_v50 = vsel %vm1036_vm8, %v976_v10, %v1035_v41  ;;  %v2241_v52 = vpop.xlane.xlu1 %987 }
 0x2a8   : > { %v1618_v55 = vpop.eup %1617  ;;  %v1040_v56 = vsel %vm1038_vm9, %v1039_v47, %v1037_v50  ;;  %1629 = vrsqrt.f32 %v2241_v52  ;;  %vm1064_vm0 = vcmp.eq.f32.partialorder %v2241_v52, inf  ;;  %v1067_v47 = vand.u32 2147483648, %v2241_v52 }
 0x2a9   : > { %v1620_v57 = vpop.eup %1619  ;;  %v1128_v9 = vadd.f32 1e-07, %v1040_v56  ;;  %v1042_v60 = vmul.f32 %v1618_v55, %v979_v15  ;;  %vm1066_vm1 = vcmp.eq.f32.partialorder %v2241_v52, 0.0 }
 0x2aa   : > { %v1622_v63 = vpop.eup %1621  ;;  %v1157_v1 = vmul.f32 %v1620_v57, %v2082_v46  ;;  %v1158_v2 = vmul.f32 %v1620_v57, %v2085_v48  ;;  %v1053_v46 = vand.u32 2147483648, %v982_v22 }
 0x2ab   : > { %1631 = vrcp.f32 %v1128_v9  ;;  %v1044_v7 = vsel %vm1043_vm10, %v979_v15, %v1042_v60  ;;  %v1049_v10 = vmul.f32 %v1622_v63, %v982_v22 }
 0x2ac   : > { %1189 = vst [vmem:[%s2248_s14] sm:$0xff] %v1157_v1  ;;  %1190 = vst [vmem:[%s2248_s14 + $0x8] sm:$0xff] %v1158_v2  ;;  %v1047_v8 = vsel %vm1045_vm11, %v1046_v5, %v1044_v7 }
 0x2ad   : > { %v1624_v12 = vpop.eup %1623  ;;  %v1129_v48 = vadd.f32 1e-07, %v1047_v8  ;;  %v1051_v14 = vsel %vm1050_vm12, %v982_v22, %v1049_v10  ;;  %v2252_v18 = vpop.xlane.xlu0 %990 }
 0x2ae   : > { %v1159_v15 = vmul.f32 %v1624_v12, %v2088_v49  ;;  %v1160_v21 = vmul.f32 %v1624_v12, %v2093_v51  ;;  %v1054_v24 = vsel %vm1052_vm13, %v1053_v46, %v1051_v14  ;;  %1633 = vrsqrt.f32 %v2252_v18 }
 0x2af   : > { %1635 = vrcp.f32 %v1129_v48  ;;  %v1130_v25 = vadd.f32 1e-07, %v1054_v24  ;;  %v2257_v29 = vpop.xlane.xlu1 %993  ;;  %vm1071_vm2 = vcmp.eq.f32.partialorder %v2252_v18, inf  ;;  %v1074_v5 = vand.u32 2147483648, %v2252_v18 }
 0x2b0   : > { %v1626_v30 = vpop.eup %1625  ;;  %1191 = vst [vmem:[%s2248_s14 + $0x10] sm:$0xff] %v1159_v15  ;;  %1192 = vst [vmem:[%s2248_s14 + $0x18] sm:$0xff] %v1160_v21  ;;  %1637 = vrsqrt.f32 %v2257_v29  ;;  %vm1073_vm3 = vcmp.eq.f32.partialorder %v2252_v18, 0.0  ;;  %vm1078_vm4 = vcmp.eq.f32.partialorder %v2257_v29, inf  ;;  %v1081_v12 = vand.u32 2147483648, %v2257_v29 }
 0x2b1   : > { %v1628_v22 = vpop.eup %1627  ;;  %1639 = vrcp.f32 %v1130_v25  ;;  %v1056_v32 = vmul.f32 %v1626_v30, %v985_v44  ;;  %vm1080_vm5 = vcmp.eq.f32.partialorder %v2257_v29, 0.0 }
 0x2b2   : > { %v1630_v49 = vpop.eup %1629  ;;  %v1161_v51 = vmul.f32 %v1628_v22, %v2102_v59  ;;  %v1162_v33 = vmul.f32 %v1628_v22, %v2105_v61 }
 0x2b3   : > { %v1058_v37 = vsel %vm1057_vm14, %v985_v44, %v1056_v32  ;;  %v1063_v39 = vmul.f32 %v1630_v49, %v2241_v52 }
 0x2b4   : > { %1193 = vst [vmem:[%s2248_s14 + $0x20] sm:$0xff] %v1161_v51  ;;  %1194 = vst [vmem:[%s2248_s14 + $0x28] sm:$0xff] %v1162_v33  ;;  %v1061_v41 = vsel %vm1059_vm15, %v1060_v35, %v1058_v37 }
 0x2b5   : > { %v1632_v50 = vpop.eup %1631  ;;  %v1131_v55 = vadd.f32 1e-07, %v1061_v41  ;;  %v1065_v59 = vsel %vm1064_vm0, %v2241_v52, %v1063_v39  ;;  %v2271_v61 = vpop.xlane.xlu0 %996 }
 0x2b6   : > { %v1163_v44 = vmul.f32 %v1632_v50, %v2108_v0  ;;  %v1164_v56 = vmul.f32 %v1632_v50, %v2113_v4  ;;  %v1068_v57 = vsel %vm1066_vm1, %v1067_v47, %v1065_v59  ;;  %1641 = vrsqrt.f32 %v2271_v61 }
 0x2b7   : > { %1643 = vrcp.f32 %v1131_v55  ;;  %v1132_v9 = vadd.f32 1e-07, %v1068_v57  ;;  %v2276_v60 = vpop.xlane.xlu1 %999  ;;  %vm1085_vm6 = vcmp.eq.f32.partialorder %v2271_v61, inf  ;;  %v1088_v32 = vand.u32 2147483648, %v2271_v61 }
 0x2b8   : > { %v1634_v63 = vpop.eup %1633  ;;  %1195 = vst [vmem:[%s2248_s14 + $0x30] sm:$0xff] %v1163_v44  ;;  %1196 = vst [vmem:[%s2248_s14 + $0x38] sm:$0xff] %v1164_v56  ;;  %1645 = vrsqrt.f32 %v2276_v60  ;;  %vm1087_vm7 = vcmp.eq.f32.partialorder %v2271_v61, 0.0  ;;  %vm1092_vm8 = vcmp.eq.f32.partialorder %v2276_v60, inf  ;;  %v1095_v37 = vand.u32 2147483648, %v2276_v60 }
 0x2b9   : > { %v1636_v52 = vpop.eup %1635  ;;  %1647 = vrcp.f32 %v1132_v9  ;;  %v1070_v0 = vmul.f32 %v1634_v63, %v2252_v18  ;;  %vm1094_vm9 = vcmp.eq.f32.partialorder %v2276_v60, 0.0 }
 0x2ba   : > { %v1638_v1 = vpop.eup %1637  ;;  %v1165_v4 = vmul.f32 %v1636_v52, %v2122_v11  ;;  %v1166_v2 = vmul.f32 %v1636_v52, %v2125_v13 }
 0x2bb   : > { %v1640_v7 = vpop.eup %1639  ;;  %v1072_v10 = vsel %vm1071_vm2, %v2252_v18, %v1070_v0  ;;  %v1077_v8 = vmul.f32 %v1638_v1, %v2257_v29 }
 0x2bc   : > { %1197 = vst [vmem:[%s2248_s14 + $0x40] sm:$0xff] %v1165_v4  ;;  %1198 = vst [vmem:[%s2248_s14 + $0x48] sm:$0xff] %v1166_v2  ;;  %v1167_v11 = vmul.f32 %v1640_v7, %v2130_v17  ;;  %v1168_v13 = vmul.f32 %v1640_v7, %v2135_v20  ;;  %v1075_v46 = vsel %vm1073_vm3, %v1074_v5, %v1072_v10 }
 0x2bd   : > { %v1133_v48 = vadd.f32 1e-07, %v1075_v46  ;;  %v1079_v14 = vsel %vm1078_vm4, %v2257_v29, %v1077_v8  ;;  %v1003_v15 = vpop.xlane.xlu0 %1002 }
 0x2be   : > { %1199 = vst [vmem:[%s2248_s14 + $0x50] sm:$0xff] %v1167_v11  ;;  %1200 = vst [vmem:[%s2248_s14 + $0x58] sm:$0xff] %v1168_v13  ;;  %v1082_v18 = vsel %vm1080_vm5, %v1081_v12, %v1079_v14  ;;  %1649 = vrsqrt.f32 %v1003_v15  ;;  %vm1099_vm10 = vcmp.eq.f32.partialorder %v1003_v15, inf  ;;  %v1102_v9 = vand.u32 2147483648, %v1003_v15 }
 0x2bf   : > { %1651 = vrcp.f32 %v1133_v48  ;;  %v1134_v21 = vadd.f32 1e-07, %v1082_v18  ;;  %v1006_v24 = vpop.xlane.xlu1 %1005  ;;  %vm1101_vm11 = vcmp.eq.f32.partialorder %v1003_v15, 0.0 }
 0x2c0   : > { %v1642_v17 = vpop.eup %1641  ;;  %1653 = vrsqrt.f32 %v1006_v24  ;;  %vm1106_vm12 = vcmp.eq.f32.partialorder %v1006_v24, inf  ;;  %v1109_v2 = vand.u32 2147483648, %v1006_v24  ;;  %vm1108_vm13 = vcmp.eq.f32.partialorder %v1006_v24, 0.0 }
 0x2c1   : > { %v1644_v20 = vpop.eup %1643  ;;  %1655 = vrcp.f32 %v1134_v21  ;;  %v1084_v25 = vmul.f32 %v1642_v17, %v2271_v61 }
 0x2c2   : > { %v1646_v30 = vpop.eup %1645  ;;  %v1169_v22 = vmul.f32 %v1644_v20, %v2142_v26  ;;  %v1170_v29 = vmul.f32 %v1644_v20, %v2145_v28 }
 0x2c3   : > { %v1648_v49 = vpop.eup %1647  ;;  %v1086_v51 = vsel %vm1085_vm6, %v2271_v61, %v1084_v25  ;;  %v1091_v33 = vmul.f32 %v1646_v30, %v2276_v60 }
 0x2c4   : > { %1201 = vst [vmem:[%s2248_s14 + $0x60] sm:$0xff] %v1169_v22  ;;  %1202 = vst [vmem:[%s2248_s14 + $0x68] sm:$0xff] %v1170_v29  ;;  %v1171_v26 = vmul.f32 %v1648_v49, %v2150_v31  ;;  %v1172_v28 = vmul.f32 %v1648_v49, %v2155_v34  ;;  %v1089_v35 = vsel %vm1087_vm7, %v1088_v32, %v1086_v51 }
 0x2c5   : > { %v1135_v39 = vadd.f32 1e-07, %v1089_v35  ;;  %v1093_v41 = vsel %vm1092_vm8, %v2276_v60, %v1091_v33  ;;  %v1009_v47 = vpop.xlane.xlu0 %1008 }
 0x2c6   : > { %1203 = vst [vmem:[%s2248_s14 + $0x70] sm:$0xff] %v1171_v26  ;;  %1204 = vst [vmem:[%s2248_s14 + $0x78] sm:$0xff] %v1172_v28  ;;  %v1096_v50 = vsel %vm1094_vm9, %v1095_v37, %v1093_v41  ;;  %1657 = vrsqrt.f32 %v1009_v47  ;;  %vm1113_vm14 = vcmp.eq.f32.partialorder %v1009_v47, inf  ;;  %v1116_v46 = vand.u32 2147483648, %v1009_v47 }
 0x2c7   : > { %1659 = vrcp.f32 %v1135_v39  ;;  %v1136_v55 = vadd.f32 1e-07, %v1096_v50  ;;  %v1012_v59 = vpop.xlane.xlu1 %1011  ;;  %vm1115_vm15 = vcmp.eq.f32.partialorder %v1009_v47, 0.0 }
 0x2c8   : > { %v1650_v31 = vpop.eup %1649  ;;  %1661 = vrsqrt.f32 %v1012_v59  ;;  %vm1120_vm0 = vcmp.eq.f32.partialorder %v1012_v59, inf  ;;  %vm1122_vm1 = vcmp.eq.f32.partialorder %v1012_v59, 0.0 }
 0x2c9   : > { %v1652_v34 = vpop.eup %1651  ;;  %1663 = vrcp.f32 %v1136_v55  ;;  %v1098_v61 = vmul.f32 %v1650_v31, %v1003_v15 }
 0x2ca   : > { %v1654_v44 = vpop.eup %1653  ;;  %v1173_v56 = vmul.f32 %v1652_v34, %v2162_v40  ;;  %v1174_v57 = vmul.f32 %v1652_v34, %v2165_v42 }
 0x2cb   : > { %v1656_v60 = vpop.eup %1655  ;;  %v1100_v63 = vsel %vm1099_vm10, %v1003_v15, %v1098_v61  ;;  %v1105_v52 = vmul.f32 %v1654_v44, %v1006_v24 }
 0x2cc   : > { %1205 = vst [vmem:[%s2248_s14 + $0x80] sm:$0xff] %v1173_v56  ;;  %1206 = vst [vmem:[%s2248_s14 + $0x88] sm:$0xff] %v1174_v57  ;;  %v1175_v0 = vmul.f32 %v1656_v60, %v2170_v45  ;;  %v1176_v1 = vmul.f32 %v1656_v60, %v2175_v54  ;;  %v1103_v4 = vsel %vm1101_vm11, %v1102_v9, %v1100_v63 }
 0x2cd   : > { %v1137_v40 = vadd.f32 1e-07, %v1103_v4  ;;  %v1107_v5 = vsel %vm1106_vm12, %v1006_v24, %v1105_v52 }
 0x2ce   : > { %1207 = vst [vmem:[%s2248_s14 + $0x90] sm:$0xff] %v1175_v0  ;;  %1208 = vst [vmem:[%s2248_s14 + $0x98] sm:$0xff] %v1176_v1  ;;  %v1110_v42 = vsel %vm1108_vm13, %v1109_v2, %v1107_v5 }
 0x2cf   : > { %1665 = vrcp.f32 %v1137_v40  ;;  %v1138_v7 = vadd.f32 1e-07, %v1110_v42 }
 0x2d0   : > { %v1658_v10 = vpop.eup %1657 }
 0x2d1   : > { %v1660_v8 = vpop.eup %1659  ;;  %1667 = vrcp.f32 %v1138_v7  ;;  %v1112_v11 = vmul.f32 %v1658_v10, %v1009_v47 }
 0x2d2   : > { %v1662_v13 = vpop.eup %1661  ;;  %v1177_v45 = vmul.f32 %v1660_v8, %v2182_v58  ;;  %v1178_v54 = vmul.f32 %v1660_v8, %v2185_v62  ;;  %v1123_v58 = vand.u32 2147483648, %v1012_v59 }
 0x2d3   : > { %v1664_v12 = vpop.eup %1663  ;;  %v1114_v48 = vsel %vm1113_vm14, %v1009_v47, %v1112_v11  ;;  %v1119_v14 = vmul.f32 %v1662_v13, %v1012_v59 }
 0x2d4   : > { %1209 = vst [vmem:[%s2248_s14 + $0xa0] sm:$0xff] %v1177_v45  ;;  %1210 = vst [vmem:[%s2248_s14 + $0xa8] sm:$0xff] %v1178_v54  ;;  %v1179_v15 = vmul.f32 %v1664_v12, %v2190_v3  ;;  %v1180_v18 = vmul.f32 %v1664_v12, %v2195_v6  ;;  %v1117_v21 = vsel %vm1115_vm15, %v1116_v46, %v1114_v48 }
 0x2d5   : > { %v1139_v62 = vadd.f32 1e-07, %v1117_v21  ;;  %v1121_v24 = vsel %vm1120_vm0, %v1012_v59, %v1119_v14 }
 0x2d6   : > { %1211 = vst [vmem:[%s2248_s14 + $0xb0] sm:$0xff] %v1179_v15  ;;  %1212 = vst [vmem:[%s2248_s14 + $0xb8] sm:$0xff] %v1180_v18  ;;  %v1124_v17 = vsel %vm1122_vm1, %v1123_v58, %v1121_v24 }
 0x2d7   : > { %1669 = vrcp.f32 %v1139_v62  ;;  %v1140_v20 = vadd.f32 1e-07, %v1124_v17 }
 0x2d9   : > { %v1666_v25 = vpop.eup %1665  ;;  %1671 = vrcp.f32 %v1140_v20 }
 0x2da   : > { %v1181_v3 = vmul.f32 %v1666_v25, %v2202_v16  ;;  %v1182_v6 = vmul.f32 %v1666_v25, %v2205_v19 }
 0x2db   : > { %v1668_v30 = vpop.eup %1667 }
 0x2dc   : > { %1213 = vst [vmem:[%s2248_s14 + $0xc0] sm:$0xff] %v1181_v3  ;;  %1214 = vst [vmem:[%s2248_s14 + $0xc8] sm:$0xff] %v1182_v6  ;;  %v1183_v22 = vmul.f32 %v1668_v30, %v2210_v23  ;;  %v1184_v29 = vmul.f32 %v1668_v30, %v2215_v27 }
 0x2de   : > { %1215 = vst [vmem:[%s2248_s14 + $0xd0] sm:$0xff] %v1183_v22  ;;  %1216 = vst [vmem:[%s2248_s14 + $0xd8] sm:$0xff] %v1184_v29 }
 0x2e1   : > { %v1670_v16 = vpop.eup %1669 }
 0x2e2   : > { %v1185_v19 = vmul.f32 %v1670_v16, %v2222_v36  ;;  %v1186_v32 = vmul.f32 %v1670_v16, %v2225_v38 }
 0x2e3   : > { %v1672_v49 = vpop.eup %1671 }
 0x2e4   : > { %1217 = vst [vmem:[%s2248_s14 + $0xe0] sm:$0xff] %v1185_v19  ;;  %1218 = vst [vmem:[%s2248_s14 + $0xe8] sm:$0xff] %v1186_v32  ;;  %v1187_v23 = vmul.f32 %v1672_v49, %v2230_v43  ;;  %v1188_v27 = vmul.f32 %v1672_v49, %v2235_v53 }
 0x2e6   : > { %1219 = vst [vmem:[%s2248_s14 + $0xf0] sm:$0xff] %v1187_v23  ;;  %1220 = vst [vmem:[%s2248_s14 + $0xf8] sm:$0xff] %v1188_v27 }
 0x2e7   : > { %1716 = shalt.err (!%p1713_p4)
}
 0x2e8   : > { %s1717_s28 = scalar_lea.hbm %s2348_s13, 4096  ;;  %s1721_s11 = scalar_lea.hbm %s2410_s5, 8192 }
 0x2e9   : > { %p1718_p7 = scmp.ne.s32.totalorder %s2348_s13, %s1717_s28  ;;  %p1722_p1 = scmp.lt.u32.totalorder %s2348_s13, %s2410_s5 }
 0x2ea   : > { %p1723_p3 = scmp.lt.u32.totalorder %s1721_s11, %s1717_s28  ;;  %p1725_p8 = scmp.lt.u32.totalorder %s1717_s28, %s2348_s13 }
 0x2eb   : > { %p1719_p10 = pnand %p1718_p7, %p2420_p11 }
 0x2ec   : > { %p1724_p9 = por %p1723_p3, %p1722_p1 }
 0x2ed   : > { %p1720_p12 = pneg %p1719_p10 }
 0x2ee   : > { %p1726_p0 = por %p1725_p8, %p1724_p9 }
 0x2f0   : > { %p1727_p6 = pnand %p1726_p0, %p1720_p12 }
 0x2f2   : > { %1730 = shalt.err (!%p1727_p6)
}
 0x2f3   : > { %s1792_s9 = smov 256   ;;  %s1793_s12 = smov 16  }
 0x2f4   : > { %1486 = dma.vmem_to_hbm [thread:$0]  (%p2420_p11), %s2350_s30, 4096, %s2348_s13, %s1222_s21, %s1792_s9, %s1792_s9, %s1793_s12  }
 0x2f5 PF: > { %s1253_s15 = sand.u32 1, %s1765_s18   ;;  %p2421_p13 = scmp.ne.s32.totalorder %s2416_s8, 0 }
 0x2f6   : > { %p2422_p2 = scmp.ge.s32.totalorder %s1785_s23, 2  ;;  %s1254_s25 = scalar_lea.sflag [#allocation4], %s1253_s15 }
 0x2f8   : > { %p1493_p5 = pnand %p2422_p2, %p2421_p13 }
 0x2fa   : > { %1760 = dma.done.wait (!%p1493_p5), %s1254_s25, 4096  }
 0x2fb   : > { %1762 = vsyncadd (!%p1493_p5), %s1254_s25, 4294963200  ;;  %s21_s23 = sadd.s32 1, %s1785_s23   ;;  %s2423_s18 = smov %s1769_s19 }
 0x2fc   : > { %p18_p4 = scmp.ge.s32.totalorder %s21_s23, 4   ;;  %s2424_s19 = smov %s1773_s20 }
 0x2fd   : > { %s2425_s20 = smov %s1880_s7  ;;  %s2426_s21 = smov %s1781_s22 }
 0x2fe   : > { %s2427_s22 = smov %s2429_s26  ;;  %20 = sbr.rel (!%p18_p4) target bundleno = 6 (0x6), region = 97 }
 0x305   :  { %1259 = vsyncpa [#allocation3], 1 }
 0x306   :  { %1261 = vsyncpa [#allocation3 + $0x1], 1 }
 0x307   :  { %1262 = vsyncpa [#allocation4], 1 }
 0x308   :  { %1264 = vsyncpa [#allocation4 + $0x1], 1 }

</bundles_post_ra>
